<compile_context>
chip_gen: v7x
topology: tpu7x:2x2x1
jax: 0.10.0
libtpu: 0.0.40
codegen_flags: <defaults>
</compile_context>

<pallas_src>
import functools

import jax
import jax.numpy as jnp
import numpy as np
from jax.experimental import pallas as pl
from jax.experimental.pallas import tpu as pltpu


def _dual_conv_kernel(xm_ref, xh_ref, w_ref, b_ref, o_ref, *, wpad, cout, tm):
    """One lane-tile of the fused dual conv.

    xm_ref: (Cp, tm)       bf16  main band of the channel-major flat padded input
    xh_ref: (Cp, halo)     bf16  halo band (lanes just past the main band, for the shifts)
    w_ref : (2*Cout, 9*Cp) bf16  fused [conv1; conv2] weights
    b_ref : (2*Cout, 1)    f32   fused biases
    o_ref : (Cout, tm)     f32   relu(conv1) + relu(conv2) for this tile
    """
    # Widen to f32 for the tap relayouts (unaligned lane shifts + sublane concat are the
    # cheapest / best-supported on 32-bit lanes), then feed the MXU in bf16.
    xw = jnp.concatenate([xm_ref[...], xh_ref[...]], axis=-1).astype(jnp.float32)
    taps = [xw[:, dy * wpad + dx: dy * wpad + dx + tm]      # static lane shift per 3x3 tap
            for dy in range(3) for dx in range(3)]          # 9 x (Cp, tm)
    patches = jnp.concatenate(taps, axis=0).astype(jnp.bfloat16)   # (9*Cp, tm)

    # Both conv paths in one MXU matmul, f32 accumulation.
    y = jnp.dot(w_ref[...], patches, preferred_element_type=jnp.float32)  # (2*Cout, tm)
    y = jnp.maximum(y + b_ref[...], 0.0)                    # bias + ReLU for both paths
    o_ref[...] = y[:cout, :] + y[cout:, :]                  # relu(path1) + relu(path2)


@functools.partial(jax.jit, static_argnames=("tm_max",))
def dual_conv_path(x_nchw, w1, b1, w2, b2, *, tm_max=2048):
    """x_nchw: (N, Cin, H, W); w*: (Cout, Cin, 3, 3) (PyTorch OIHW); b*: (Cout,)."""
    N, C, H, W = x_nchw.shape
    Cout = w1.shape[0]
    assert w1.shape == (Cout, C, 3, 3) and w2.shape == (Cout, C, 3, 3)

    Wp = W + 2                         # padded row stride (lanes per padded image row)
    Cp = 8 * pl.cdiv(C, 8)             # channels padded to a sublane multiple
    K = 9 * Cp
    L = N * (H + 2) * Wp               # flat padded pixel domain (per channel)

    max_shift = 2 * Wp + 2             # largest tap shift (dy=2, dx=2)
    halo = 128 * pl.cdiv(max_shift, 128)

    # Lane tile: multiple of 128 (and of halo), capped at tm_max, aiming for >= ~4 grid
    # steps so the single 'parallel' axis can still be sharded across TensorCores.
    tm = 128 * max(1, min(tm_max // 128, pl.cdiv(pl.cdiv(L, 128), 4)))
    tm = halo * pl.cdiv(tm, halo)
    G = pl.cdiv(L, tm)
    Lpad = G * tm
    Lin = Lpad + halo

    # ---- layout glue (one fused XLA pass; nothing 9x is materialized) ----
    # NCHW -> pad channels to Cp & spatial by 1 -> channel-major flat (Cp, Lin) in bf16.
    xp = jnp.pad(x_nchw, ((0, 0), (0, Cp - C), (1, 1), (1, 1)))       # (N, Cp, H+2, W+2)
    xflat = jnp.transpose(xp, (1, 0, 2, 3)).reshape(Cp, L)
    xflat = jnp.pad(xflat, ((0, 0), (0, Lin - L))).astype(jnp.bfloat16)

    # OIHW -> (Cout, ky, kx, Cin) -> pad Cin to Cp -> (Cout, 9*Cp); stack both paths on rows.
    def _pack(w):
        wt = jnp.transpose(w, (0, 2, 3, 1))                           # (Cout, 3, 3, Cin)
        wt = jnp.pad(wt, ((0, 0), (0, 0), (0, 0), (0, Cp - C)))
        return wt.reshape(Cout, K)

    w_fused = jnp.concatenate([_pack(w1), _pack(w2)], axis=0).astype(jnp.bfloat16)
    b_fused = jnp.concatenate([b1, b2], axis=0).reshape(2 * Cout, 1).astype(jnp.float32)

    step = tm // halo
    kernel = functools.partial(_dual_conv_kernel, wpad=Wp, cout=Cout, tm=tm)
    cost = pl.CostEstimate(
        flops=2 * (2 * Cout) * K * Lpad,
        transcendentals=0,
        bytes_accessed=(Cp * (Lpad + G * halo) * 2 + w_fused.size * 2
                        + b_fused.size * 4 + Cout * Lpad * 4))

    out_flat = pl.pallas_call(
        kernel,
        out_shape=jax.ShapeDtypeStruct((Cout, Lpad), jnp.float32),
        grid=(G,),
        in_specs=[
            pl.BlockSpec((Cp, tm), lambda i: (0, i)),                 # main band
            pl.BlockSpec((Cp, halo), lambda i: (0, (i + 1) * step)),  # halo band
            pl.BlockSpec((2 * Cout, K), lambda i: (0, 0)),            # fused weights (resident)
            pl.BlockSpec((2 * Cout, 1), lambda i: (0, 0)),            # fused bias
        ],
        out_specs=pl.BlockSpec((Cout, tm), lambda i: (0, i)),
        compiler_params=pltpu.CompilerParams(
            dimension_semantics=("parallel",),
            vmem_limit_bytes=32 * 1024 * 1024),
        cost_estimate=cost,
    )(xflat, xflat, w_fused, b_fused)

    # (Cout, Lpad) -> drop pad lanes -> (Cout, N, H+2, W+2) -> valid HxW -> NCHW.
    out = out_flat[:, :L].reshape(Cout, N, H + 2, Wp)[:, :, :H, :W]
    return jnp.transpose(out, (1, 0, 2, 3))


def _reference(x, w1, b1, w2, b2):
    """Pure-JAX reference for Conv2d(k=3, padding=1)+ReLU on two paths, summed.

    Inputs are quantized to bf16 exactly as the kernel quantizes its MXU operands, so the
    comparison isolates kernel correctness from bf16 rounding of the inputs.
    """
    q = lambda a: a.astype(jnp.bfloat16).astype(jnp.float32)
    dn = ("NCHW", "OIHW", "NCHW")
    p1 = jax.lax.conv_general_dilated(q(x), q(w1), (1, 1), "SAME", dimension_numbers=dn,
                                      precision=jax.lax.Precision.HIGHEST)
    p1 = jax.nn.relu(p1 + b1[None, :, None, None])
    p2 = jax.lax.conv_general_dilated(q(x), q(w2), (1, 1), "SAME", dimension_numbers=dn,
                                      precision=jax.lax.Precision.HIGHEST)
    p2 = jax.nn.relu(p2 + b2[None, :, None, None])
    return p1 + p2


if __name__ == "__main__":
    # Small shapes consistent with the module: in_channels=4, batch=2, 16x16 spatial.
    N, C, H, W = 2, 4, 16, 16
    key = jax.random.PRNGKey(0)
    kx, kw1, kb1, kw2, kb2 = jax.random.split(key, 5)

    x = jax.random.normal(kx, (N, C, H, W), dtype=jnp.float32)

    # Deterministic Conv2d-style parameters: (Cout, Cin, 3, 3) weights, (Cout,) biases.
    fan_in = C * 3 * 3
    bound = 1.0 / np.sqrt(fan_in)
    w1 = jax.random.uniform(kw1, (C, C, 3, 3), jnp.float32, -bound, bound)
    b1 = jax.random.uniform(kb1, (C,), jnp.float32, -bound, bound)
    w2 = jax.random.uniform(kw2, (C, C, 3, 3), jnp.float32, -bound, bound)
    b2 = jax.random.uniform(kb2, (C,), jnp.float32, -bound, bound)

    out = jax.block_until_ready(dual_conv_path(x, w1, b1, w2, b2))
    ref = jax.block_until_ready(_reference(x, w1, b1, w2, b2))
    np.testing.assert_allclose(np.asarray(out), np.asarray(ref), rtol=1e-4, atol=1e-4)

    print("KERNEL_OK")
</pallas_src>

<mosaic_0001>
module attributes {stable_mosaic.version = 11 : i64} {
  func.func @_dual_conv_kernel(%arg0: i32, %arg1: memref<8x256xbf16, #tpu.memory_space<vmem>>, %arg2: memref<8x128xbf16, #tpu.memory_space<vmem>>, %arg3: memref<8x72xbf16, #tpu.memory_space<vmem>>, %arg4: memref<8x1xf32, #tpu.memory_space<vmem>>, %arg5: memref<4x256xf32, #tpu.memory_space<vmem>>) attributes {dimension_semantics = [#tpu.dimension_semantics<parallel>], iteration_bounds = array<i64: 3>, scalar_prefetch = 0 : i64, scratch_operands = 0 : i64, tpu.core_type = #tpu.core_type<tc>, window_params = [{transform_indices = @transform_0, window_bounds = array<i64: 8, 256>}, {transform_indices = @transform_1, window_bounds = array<i64: 8, 128>}, {pipeline_mode = #tpu.pipeline_mode<synchronous>, transform_indices = @transform_2, window_bounds = array<i64: 8, 72>}, {pipeline_mode = #tpu.pipeline_mode<synchronous>, transform_indices = @transform_3, window_bounds = array<i64: 8, 1>}, {transform_indices = @transform_4, window_bounds = array<i64: 4, 256>}]} {
    %c0 = arith.constant 0 : index
    %c0_0 = arith.constant 0 : index
    %0 = vector.load %arg1[%c0, %c0_0] : memref<8x256xbf16, #tpu.memory_space<vmem>>, vector<8x256xbf16>
    %c0_1 = arith.constant 0 : index
    %c0_2 = arith.constant 0 : index
    %1 = vector.load %arg2[%c0_1, %c0_2] : memref<8x128xbf16, #tpu.memory_space<vmem>>, vector<8x128xbf16>
    %2 = tpu.concatenate %0, %1 in 1 : vector<8x256xbf16>, vector<8x128xbf16> -> vector<8x384xbf16>
    %3 = arith.extf %2 : vector<8x384xbf16> to vector<8x384xf32>
    %4 = vector.extract_strided_slice %3 {offsets = [0, 0], sizes = [8, 256], strides = [1, 1]} : vector<8x384xf32> to vector<8x256xf32>
    %5 = vector.extract_strided_slice %3 {offsets = [0, 1], sizes = [8, 256], strides = [1, 1]} : vector<8x384xf32> to vector<8x256xf32>
    %6 = vector.extract_strided_slice %3 {offsets = [0, 2], sizes = [8, 256], strides = [1, 1]} : vector<8x384xf32> to vector<8x256xf32>
    %7 = vector.extract_strided_slice %3 {offsets = [0, 18], sizes = [8, 256], strides = [1, 1]} : vector<8x384xf32> to vector<8x256xf32>
    %8 = vector.extract_strided_slice %3 {offsets = [0, 19], sizes = [8, 256], strides = [1, 1]} : vector<8x384xf32> to vector<8x256xf32>
    %9 = vector.extract_strided_slice %3 {offsets = [0, 20], sizes = [8, 256], strides = [1, 1]} : vector<8x384xf32> to vector<8x256xf32>
    %10 = vector.extract_strided_slice %3 {offsets = [0, 36], sizes = [8, 256], strides = [1, 1]} : vector<8x384xf32> to vector<8x256xf32>
    %11 = vector.extract_strided_slice %3 {offsets = [0, 37], sizes = [8, 256], strides = [1, 1]} : vector<8x384xf32> to vector<8x256xf32>
    %12 = vector.extract_strided_slice %3 {offsets = [0, 38], sizes = [8, 256], strides = [1, 1]} : vector<8x384xf32> to vector<8x256xf32>
    %13 = tpu.concatenate %4, %5, %6, %7, %8, %9, %10, %11, %12 in 0 : vector<8x256xf32>, vector<8x256xf32>, vector<8x256xf32>, vector<8x256xf32>, vector<8x256xf32>, vector<8x256xf32>, vector<8x256xf32>, vector<8x256xf32>, vector<8x256xf32> -> vector<72x256xf32>
    %14 = arith.truncf %13 : vector<72x256xf32> to vector<72x256xbf16>
    %c0_3 = arith.constant 0 : index
    %c0_4 = arith.constant 0 : index
    %15 = vector.load %arg3[%c0_3, %c0_4] : memref<8x72xbf16, #tpu.memory_space<vmem>>, vector<8x72xbf16>
    %cst = arith.constant dense<0.000000e+00> : vector<8x256xf32>
    %16 = tpu.matmul %15, %14, %cst {dimension_numbers = #tpu.dot_dimension_numbers<[1], [0], [0], [1], [0, 0, 1, 1], [], []>} : vector<8x72xbf16>, vector<72x256xbf16>, vector<8x256xf32> -> vector<8x256xf32>
    %c0_5 = arith.constant 0 : index
    %c0_6 = arith.constant 0 : index
    %17 = vector.load %arg4[%c0_5, %c0_6] : memref<8x1xf32, #tpu.memory_space<vmem>>, vector<8x1xf32>
    %18 = vector.broadcast %17 : vector<8x1xf32> to vector<8x256xf32>
    %19 = arith.addf %16, %18 : vector<8x256xf32>
    %cst_7 = arith.constant 0.000000e+00 : f32
    %20 = vector.broadcast %cst_7 : f32 to vector<8x256xf32>
    %21 = arith.maximumf %19, %20 : vector<8x256xf32>
    %22 = vector.extract_strided_slice %21 {offsets = [0, 0], sizes = [4, 256], strides = [1, 1]} : vector<8x256xf32> to vector<4x256xf32>
    %23 = vector.extract_strided_slice %21 {offsets = [4, 0], sizes = [4, 256], strides = [1, 1]} : vector<8x256xf32> to vector<4x256xf32>
    %24 = arith.addf %22, %23 : vector<4x256xf32>
    %c0_8 = arith.constant 0 : index
    %c0_9 = arith.constant 0 : index
    %25 = vector.load %arg5[%c0_8, %c0_9] : memref<4x256xf32, #tpu.memory_space<vmem>>, vector<4x256xf32>
    tpu.vector_store %arg5[%c0_8, %c0_9], %24 {strides = array<i32>} : memref<4x256xf32, #tpu.memory_space<vmem>>, vector<4x256xf32>,
    return
  }
  func.func @transform_0(%arg0: i32) -> (i32, i32) {
    %c0_i32 = arith.constant 0 : i32
    %c0_i32_0 = arith.constant 0 : i32
    return %c0_i32, %arg0 : i32, i32
  }
  func.func @transform_1(%arg0: i32) -> (i32, i32) {
    %c1_i32 = arith.constant 1 : i32
    %0 = arith.addi %arg0, %c1_i32 : i32
    %c2_i32 = arith.constant 2 : i32
    %1 = arith.muli %0, %c2_i32 : i32
    %c0_i32 = arith.constant 0 : i32
    %c0_i32_0 = arith.constant 0 : i32
    return %c0_i32, %1 : i32, i32
  }
  func.func @transform_2(%arg0: i32) -> (i32, i32) {
    %c0_i32 = arith.constant 0 : i32
    %c0_i32_0 = arith.constant 0 : i32
    %c0_i32_1 = arith.constant 0 : i32
    return %c0_i32, %c0_i32_0 : i32, i32
  }
  func.func @transform_3(%arg0: i32) -> (i32, i32) {
    %c0_i32 = arith.constant 0 : i32
    %c0_i32_0 = arith.constant 0 : i32
    %c0_i32_1 = arith.constant 0 : i32
    return %c0_i32, %c0_i32_0 : i32, i32
  }
  func.func @transform_4(%arg0: i32) -> (i32, i32) {
    %c0_i32 = arith.constant 0 : i32
    %c0_i32_0 = arith.constant 0 : i32
    return %c0_i32, %arg0 : i32, i32
  }
}

</mosaic_0001>

<bundles_post_ra>
// kernel: dual_conv_path.1
= control target key start
LH: loop header
LB: loop body
LE: loop exit
PB: predicated region body
PF: predicated region fallthrough
CT: control target
= control target key end

     0   :  { %s635_s15 = smov 0   ;;  %s668_s0 = inlined_call_operand.vmem [shape: bf16[8,896], index: 0, kind: input, shape index: {}, may-alias: {0,1}]   ;;  %s669_s1 = inlined_call_operand.vmem [shape: bf16[8,896], index: 1, kind: input, shape index: {}, may-alias: {0,1}]   ;;  %s670_s2 = inlined_call_operand.vmem [shape: bf16[8,72], index: 2, kind: input, shape index: {}]   ;;  %s671_s3 = inlined_call_operand.vmem [shape: f32[8,1], index: 3, kind: input, shape index: {}]   ;;  %s672_s4 = inlined_call_operand.vmem [shape: f32[4,768], index: 4, kind: output, shape index: {}]  }
   0x1 LB: > { %s508_s16 = sadd.s32 4294967295, %s599_s15   ;;  %p514_p0 = scmp.ge.s32.totalorder %s599_s15, 1  ;;  %s599_s15 = sphi %s635_s15, %s14_s15  }
   0x2   : > { %p188_p1 = scmp.lt.s32.totalorder %s599_s15, 4 }
   0x4   : > { %p189_p2 = pnand %p514_p0, %p188_p1 }
   0x5   : > { %s643_s17 = sshll.u32 (!%p189_p2), %s508_s16, 1  ;;  %s601_s28 = smov (!%p189_p2), 126   ;;  %v608_v8 = vmov (!%p189_p2), 0   ;;  %v367_v10 = vld [vmem:[%s671_s3] sm:$0xff] (!%p189_p2)  ;;  %vm274_vm0 = vcmask (!%p189_p2), 1039360   ;;  %vm296_vm1 = vcmask (!%p189_p2), 900096  }
   0x6   : > { %192 = sbr.rel (%p189_p2) target bundleno = 400 (0x190), region = 36  ;;  %p229_p3 = scmp.lt.s32.totalorder (!%p189_p2), %s643_s17, 6  ;;  %416 = vmatprep.mubr.bf16.mxu0 (!%p189_p2), %v608_v8  ;;  %590 = vset.pattern.permute.xlu0 (!%p189_p2), %v608_v8  ;;  %vm285_vm2 = vcmask (!%p189_p2), 1031168   ;;  %vm318_vm3 = vcmask (!%p189_p2), 883712   ;;  %vm307_vm4 = vcmask (!%p189_p2), 891904   ;;  %vm340_vm5 = vcmask (!%p189_p2), 744448  }
   0x7   : > { %s532_s18 = sadd.s32 (!%p189_p2), 2, %s643_s17  ;;  %s602_s29 = smov (!%p189_p2), 127   ;;  %vm329_vm6 = vcmask (!%p189_p2), 752640   ;;  %vm351_vm7 = vcmask (!%p189_p2), 736256   ;;  %vm377_vm8 = vcmask (!%p189_p2), 1043456   ;;  %vm373_vm9 = vcmask (!%p189_p2), 588800  }
   0x8   : > { %p240_p4 = scmp.lt.s32.totalorder (!%p189_p2), %s532_s18, 6  ;;  %s603_s30 = smov (!%p189_p2), 110  }
   0x9   : > { %s604_s5 = smov (!%p189_p2), 108   ;;  %s605_s6 = smov (!%p189_p2), 109  }
   0xa   : > { %s606_s7 = smov (!%p189_p2), 91   ;;  %s607_s8 = smov (!%p189_p2), 92  }
   0xb   : > { %s609_s9 = smov (!%p189_p2), 90   ;;  %p247_p5 = scmp.lt.s32.totalorder (!%p189_p2), %s643_s17, 5 }
   0xd   : > { %s230_s19 = scalar_select %p229_p3, %s643_s17, 6 }
   0xe   : > { %s674_s18 = smov (!%p240_p4, %s532_s18), 6  ;;  %s676_s17 = smov (!%p247_p5, %s643_s17), 5 }
   0xf   : > { %s516_s20 = sshll.u32 %s230_s19, 2  ;;  %s518_s24 = sshll.u32 %s674_s18, 2 }
  0x10   : > { %s232_s23 = scalar_lea.vmem %s668_s0, %s516_s20  ;;  %s243_s27 = scalar_lea.vmem %s669_s1, %s518_s24 }
  0x11   : > { %v253_v0 = vld [vmem:[%s232_s23] sm:$0xff]  ;;  %s520_s14 = sshll.u32 %s676_s17, 2 }
  0x12   : > { %v254_v1 = vld [vmem:[%s243_s27] sm:$0xf]  ;;  %v522_v2 = vcombine.high %v253_v0, %v253_v0  ;;  %v521_v5 = vcombine.low %v253_v0, %v253_v0  ;;  %s250_s19 = scalar_lea.vmem %s672_s4, %s520_s14 }
  0x13   : > { %v264_v3 = vunpack.c.l.bf16 %v254_v1 }
  0x14   : > { %v263_v4 = vunpack.c.l.bf16 %v522_v2  ;;  %v262_v7 = vunpack.c.l.bf16 %v521_v5 }
  0x16   : > { %v555_v6 = vpack.i.bf16 %v264_v3, %v263_v4  ;;  %v585_v9 = vpack.i.bf16 %v263_v4, %v262_v7 }
  0x18   : > { %556 = vrot.lane.b32.xlu1 %v555_v6, %s601_s28  ;;  %551 = vrot.lane.b32.xlu0 %v555_v6, %s602_s29 }
  0x1c   : > { %561 = vrot.lane.b32.xlu1 %v555_v6, %s603_s30  ;;  %268 = vrot.lane.b32.xlu0 %v262_v7, %s602_s29 }
  0x20   : > { %290 = vrot.lane.b32.xlu1 %v262_v7, %s603_s30  ;;  %279 = vrot.lane.b32.xlu0 %v262_v7, %s601_s28 }
  0x24   : > { %571 = vrot.lane.b32.xlu1 %v555_v6, %s604_s5  ;;  %566 = vrot.lane.b32.xlu0 %v555_v6, %s605_s6 }
  0x28   : > { %312 = vrot.lane.b32.xlu1 %v262_v7, %s604_s5  ;;  %301 = vrot.lane.b32.xlu0 %v262_v7, %s605_s6 }
  0x2c   : > { %581 = vrot.lane.b32.xlu1 %v555_v6, %s606_s7  ;;  %576 = vrot.lane.b32.xlu0 %v555_v6, %s607_s8  ;;  %v366_v6 = vld [vmem:[%s670_s2] sm:$0xf] }
  0x30   : > { %334 = vrot.lane.b32.xlu1 %v262_v7, %s606_s7  ;;  %323 = vrot.lane.b32.xlu0 %v262_v7, %s607_s8 }
  0x34   : > { %586 = vrot.lane.b32.xlu0 %v585_v9, %s609_s9  ;;  %349 = vrot.lane.b32.xlu1 %v264_v3, %s609_s9 }
  0x38   : > { %370 = vperm.xlu0 %590, %v367_v10  }
  0x8a   : > { %v557_v11 = vpop.permute.xlu1 %556  ;;  %v552_v12 = vpop.permute.xlu0 %551 }
  0x8b   : > { %v554_v13 = vunpack.i.h.bf16 %v552_v12  ;;  %v553_v14 = vunpack.i.l.bf16 %v552_v12  ;;  %v559_v15 = vunpack.i.h.bf16 %v557_v11  ;;  %v558_v16 = vunpack.i.l.bf16 %v557_v11 }
  0x8d   : > { %v276_v17 = vsel %vm274_vm0, %v553_v14, %v554_v13  ;;  %v287_v25 = vsel %vm285_vm2, %v558_v16, %v559_v15 }
  0x8e   : > { %v562_v18 = vpop.permute.xlu1 %561  ;;  %v269_v19 = vpop.permute.xlu0 %268  ;;  %v357_v20 = vpack.c.bf16 %v276_v17, %v263_v4 }
  0x8f   : > { %v564_v21 = vunpack.i.h.bf16 %v562_v18  ;;  %v563_v22 = vunpack.i.l.bf16 %v562_v18  ;;  %v275_v23 = vsel %vm274_vm0, %v269_v19, %v553_v14 }
  0x90   : > { %384 = vmatprep.subr.bf16.mxu0 %v357_v20  ;;  %v356_v24 = vpack.c.bf16 %v275_v23, %v262_v7 }
  0x91   : > { %v298_v26 = vsel %vm296_vm1, %v563_v22, %v564_v21 }
  0x92   : > { %v291_v27 = vpop.permute.xlu1 %290  ;;  %385 = vmatpush1.bf16.msra.mxu0 %v356_v24  ;;  %v280_v28 = vpop.permute.xlu0 %279  ;;  %v359_v29 = vpack.c.bf16 %v298_v26, %v287_v25 }
  0x93   : > { %v297_v30 = vsel %vm296_vm1, %v291_v27, %v563_v22  ;;  %v286_v31 = vsel %vm285_vm2, %v280_v28, %v558_v16 }
  0x94   : > { %v358_v32 = vpack.c.bf16 %v297_v30, %v286_v31  ;;  %386 = vmatprep.subr.bf16.mxu0 %v359_v29 }
  0x96   : > { %v572_v33 = vpop.permute.xlu1 %571  ;;  %387 = vmatpush1.bf16.msra.mxu0 %v358_v32  ;;  %v567_v34 = vpop.permute.xlu0 %566 }
  0x97   : > { %v574_v35 = vunpack.i.h.bf16 %v572_v33  ;;  %v573_v36 = vunpack.i.l.bf16 %v572_v33  ;;  %v569_v37 = vunpack.i.h.bf16 %v567_v34  ;;  %v568_v38 = vunpack.i.l.bf16 %v567_v34 }
  0x99   : > { %v309_v39 = vsel %vm307_vm4, %v568_v38, %v569_v37  ;;  %v320_v40 = vsel %vm318_vm3, %v573_v36, %v574_v35 }
  0x9a   : > { %v313_v41 = vpop.permute.xlu1 %312  ;;  %v302_v42 = vpop.permute.xlu0 %301  ;;  %v361_v43 = vpack.c.bf16 %v320_v40, %v309_v39 }
  0x9b   : > { %v319_v44 = vsel %vm318_vm3, %v313_v41, %v573_v36  ;;  %v308_v45 = vsel %vm307_vm4, %v302_v42, %v568_v38 }
  0x9c   : > { %v360_v46 = vpack.c.bf16 %v319_v44, %v308_v45  ;;  %388 = vmatprep.subr.bf16.mxu0 %v361_v43 }
  0x9e   : > { %v582_v47 = vpop.permute.xlu1 %581  ;;  %v577_v48 = vpop.permute.xlu0 %576  ;;  %389 = vmatpush1.bf16.msra.mxu0 %v360_v46 }
  0x9f   : > { %v584_v49 = vunpack.i.h.bf16 %v582_v47  ;;  %v583_v50 = vunpack.i.l.bf16 %v582_v47  ;;  %v579_v51 = vunpack.i.h.bf16 %v577_v48  ;;  %v578_v52 = vunpack.i.l.bf16 %v577_v48 }
  0xa1   : > { %v331_v53 = vsel %vm329_vm6, %v578_v52, %v579_v51  ;;  %v342_v54 = vsel %vm340_vm5, %v583_v50, %v584_v49 }
  0xa2   : > { %v335_v55 = vpop.permute.xlu1 %334  ;;  %v324_v56 = vpop.permute.xlu0 %323  ;;  %v363_v57 = vpack.c.bf16 %v342_v54, %v331_v53 }
  0xa3   : > { %v341_v58 = vsel %vm340_vm5, %v335_v55, %v583_v50  ;;  %v330_v59 = vsel %vm329_vm6, %v324_v56, %v578_v52 }
  0xa4   : > { %v362_v60 = vpack.c.bf16 %v341_v58, %v330_v59  ;;  %390 = vmatprep.subr.bf16.mxu0 %v363_v57 }
  0xa6   : > { %v587_v61 = vpop.permute.xlu0 %586  ;;  %391 = vmatpush1.bf16.msra.mxu0 %v362_v60  ;;  %v350_v62 = vpop.permute.xlu1 %349 }
  0xa7   : > { %v589_v63 = vunpack.i.h.bf16 %v587_v61  ;;  %v588_v0 = vunpack.i.l.bf16 %v587_v61 }
  0xa9   : > { %v353_v1 = vsel %vm351_vm7, %v589_v63, %v350_v62  ;;  %v352_v2 = vsel %vm351_vm7, %v588_v0, %v589_v63 }
  0xaa   : > { %v365_v3 = vpack.c.bf16 %v353_v1, %v353_v1  ;;  %v364_v4 = vpack.c.bf16 %v352_v2, %v352_v2 }
  0xac   : > { %523 = vmatprep.subr.msk.bf16.mxu0 %vm377_vm8, %v365_v3  ;;  %v379_v5 = vsel %vm377_vm8, %v364_v4, 0 }
  0xad   : > { %393 = vmatpush1.bf16.msra.mxu0 %v379_v5 }
  0xb0   : > { %524 = vmatmul.mubr.msk.bf16.vlgmr.msra.gmra.mrb[0].mxu0 %vm373_vm9, %v366_v6 }
  0xb7   : > { %v371_v7 = vpop.permute.xlu0 %370 }
 0x183   : > { %v418_v8 = vpop.f32.mrb[0].mxu0 }
 0x184   : > { %v419_v9 = vadd.f32 %v418_v8, %v371_v7  ;;  %v420_v10 = vpop.f32.mrb[1].mxu0 }
 0x185   : > { %v421_v11 = vadd.f32 %v420_v10, %v371_v7  ;;  %v422_v12 = vpop.f32.mrb[2].mxu0 }
 0x186   : > { %v425_v13 = vmax.f32 %v419_v9, 0.0  ;;  %v423_v14 = vpop.f32.mrb[3].mxu0 }
 0x187   : > { %v426_v15 = vmax.f32 %v421_v11, 0.0 }
 0x188   : > { %v429_v16 = vrot.slane %v425_v13, 4 }
 0x189   : > { %v430_v17 = vrot.slane %v426_v15, 4 }
 0x18a   : > { %v433_v18 = vadd.f32 %v429_v16, %v425_v13 }
 0x18b   : > { %v434_v19 = vadd.f32 %v430_v17, %v426_v15 }
 0x18d   : > { %v437_v20 = vcombine.low %v433_v18, %v434_v19 }
 0x18f   : > { %439 = vst [vmem:[%s250_s19] sm:$0xff] %v437_v20 }
 0x190 PF: > { %s14_s15 = sadd.s32 1, %s599_s15  }
 0x191   : > { %p11_p6 = scmp.ge.s32.totalorder %s14_s15, 5  }
 0x193   :  { %13 = sbr.rel (!%p11_p6) target bundleno = 1 (0x1), region = 69 }

</bundles_post_ra>
